<compile_context>
chip_gen: v7x
topology: tpu7x:2x2x1
jax: 0.10.0
libtpu: 0.0.40
codegen_flags: <defaults>
</compile_context>

<pallas_src>
import functools

import jax
import jax.numpy as jnp
from jax.experimental import pallas as pl
from jax.experimental.pallas import tpu as pltpu

_MiB = 1024 * 1024
_MAX_TM = 1024                     # returns flatten past ~512-1024 rows in tile sweeps
_DEFAULT_VMEM_CAP = 64 * _MiB      # v7x per-TC VMEM (smallest across v5e/v6e/v7x)


def _round_up(v, m):
    return -(-v // m) * m


@functools.lru_cache(maxsize=None)
def _vmem_capacity_bytes():
    try:
        return int(pltpu.get_tpu_info().vmem_capacity_bytes)
    except Exception:
        return _DEFAULT_VMEM_CAP


def _vmem_budgets():
    """(usable_bytes_for_tiling, scoped_vmem_limit_bytes) for this generation."""
    cap = _vmem_capacity_bytes()
    limit = max(min((cap * 3) // 4, cap - 16 * _MiB), 32 * _MiB)  # 48 MiB on v7x, 96 MiB on v5e/v6e
    usable = max(limit - 8 * _MiB, 16 * _MiB)                     # headroom for compiler temps
    return usable, limit


def _choose_tm(M, D, dtype, f32_temp_rows):
    """Largest sublane-aligned row tile whose double-buffered in/out blocks plus
    in-kernel f32 intermediates fit the VMEM budget, capped so the grid has at
    least 2 steps (v7x has 2 TensorCores sharded via "parallel")."""
    if M < 8:
        return M                                   # block equals full (ragged) dim
    usable, _ = _vmem_budgets()
    itemsize = jnp.dtype(dtype).itemsize
    # 2x-buffered input + 2x-buffered output + f32 working arrays inside kernel.
    per_row = 4 * D * itemsize + f32_temp_rows * D * 4
    tm = max(8, min(usable // per_row, _MAX_TM))
    if M >= 16:
        tm = min(tm, _round_up(-(-M // 2), 8))     # >= 2 grid steps
    tm = min(tm, _round_up(M, 8))
    return max(8, (tm // 8) * 8)


# ----------------------- segmented (per-group) reduce ----------------------- #
def _grouped_minmax(x, group):
    """Per-group max/min over contiguous lane segments of size `group` (power of
    two, dividing the row length), broadcast back to every element of the group.

    Stays lane-dense (no reshape to a sub-128 lane dim).  Bidirectional doubling
    tree of XLU rolls; group membership is checked by rolling the group-id
    alongside the data, so correctness does not depend on pltpu.roll's
    shift-sign convention (both rotation directions are used symmetrically).
    """
    tm, D = x.shape
    lane = jax.lax.broadcasted_iota(jnp.int32, (tm, D), 1)
    gid = lane // group
    gmax = x
    gmin = x
    s = 1
    while s < group:
        for shift in (s, D - s):                    # the two rotation directions
            gid_r = pltpu.roll(gid, shift, axis=1)
            same = gid_r == gid                     # only accept same-group sources
            vmax = pltpu.roll(gmax, shift, axis=1)
            vmin = pltpu.roll(gmin, shift, axis=1)
            gmax = jnp.where(same, jnp.maximum(gmax, vmax), gmax)
            gmin = jnp.where(same, jnp.minimum(gmin, vmin), gmin)
        s *= 2
    return gmax, gmin


# --------------------------------- kernel ----------------------------------- #
def _fake_quant_kernel(*refs, maxq, sym, group, has_clip_ref, clip_const, fast_scale):
    """Sym/asym fake quantization of one (tm, D) row tile.

    group=None  -> per-row (per-token) scale/zero.
    group=g     -> per contiguous lane-segment of size g (sub-128 groupsize path).
    """
    if has_clip_ref:
        clip_ref, x_ref, o_ref = refs
        cmax = clip_ref[0]
        cmin = clip_ref[1]
    else:
        x_ref, o_ref = refs
        cmax, cmin = clip_const

    x = x_ref[...].astype(jnp.float32)

    if group is None:
        xmax = jnp.max(x, axis=-1, keepdims=True)
        xmin = jnp.min(x, axis=-1, keepdims=True)
    else:
        xmax, xmin = _grouped_minmax(x, group)

    xmax = jnp.maximum(xmax, 0.0)
    xmin = jnp.minimum(xmin, 0.0)

    # LAC sigmoid(clip_factor) or static clip_ratio; statically elided when unused.
    if has_clip_ref or clip_const != (1.0, 1.0):
        xmax = xmax * cmax
        xmin = xmin * cmin

    maxq_f = jnp.float32(maxq)
    if sym:
        xmax = jnp.maximum(jnp.abs(xmin), xmax)
        scale = jnp.where(xmax == 0.0, jnp.float32(1.0), xmax / maxq_f)
        if fast_scale and group is None:
            # Per-row inverse + multiply (EUP work / D-x fewer divides); may differ
            # by one bin at exact boundaries -> opt-in only.
            inv = 1.0 / scale
            q = jnp.clip(jnp.round(x * inv), -(maxq_f + 1.0), maxq_f)
        else:
            q = jnp.clip(jnp.round(x / scale), -(maxq_f + 1.0), maxq_f)
        deq = scale * q
    else:
        both_zero = jnp.logical_and(xmin == 0.0, xmax == 0.0)
        xmin = jnp.where(both_zero, jnp.float32(-1.0), xmin)
        xmax = jnp.where(both_zero, jnp.float32(1.0), xmax)
        scale = (xmax - xmin) / maxq_f
        if fast_scale and group is None:
            inv = 1.0 / scale
            zero = jnp.round(-xmin * inv)
            q = jnp.clip(jnp.round(x * inv) + zero, 0.0, maxq_f)
        else:
            zero = jnp.round(-xmin / scale)
            q = jnp.clip(jnp.round(x / scale) + zero, 0.0, maxq_f)
        deq = scale * (q - zero)

    o_ref[...] = deq.astype(o_ref.dtype)


# ------------------------------ host wrapper -------------------------------- #
def _fake_quant_2d(x2d, *, maxq, sym, group=None, clip_factors=None,
                   clip_const=(1.0, 1.0), fast_scale=False, donate=False):
    """Run the kernel over an [M, D] slab, tiling M in sublane-aligned blocks."""
    M, D = x2d.shape
    has_clip_ref = clip_factors is not None
    f32_temp_rows = 3 if group is None else 8      # in-kernel f32 intermediates
    tm = _choose_tm(M, D, x2d.dtype, f32_temp_rows)
    _, vmem_limit = _vmem_budgets()

    kernel = functools.partial(
        _fake_quant_kernel, maxq=float(maxq), sym=sym, group=group,
        has_clip_ref=has_clip_ref, clip_const=tuple(clip_const),
        fast_scale=fast_scale)

    in_specs = []
    args = []
    if has_clip_ref:
        in_specs.append(pl.BlockSpec(memory_space=pltpu.MemorySpace.SMEM))
        args.append(clip_factors)
    in_specs.append(pl.BlockSpec((tm, D), lambda i: (i, 0)))
    args.append(x2d)

    io_aliases = {len(args) - 1: 0} if donate else {}

    return pl.pallas_call(
        kernel,
        out_shape=jax.ShapeDtypeStruct((M, D), x2d.dtype),
        grid=(pl.cdiv(M, tm),),
        in_specs=in_specs,
        out_specs=pl.BlockSpec((tm, D), lambda i: (i, 0)),
        input_output_aliases=io_aliases,
        compiler_params=pltpu.CompilerParams(
            dimension_semantics=("parallel",),     # shards grid across v7x TCs
            vmem_limit_bytes=vmem_limit,
        ),
    )(*args)


# ------------------------------ Module wrapper ------------------------------- #
class ActivationQuantizer:
    """JAX/Pallas port of vllm_custom ActivationQuantizer (forward only)."""

    def __init__(self, bits, sym=False, lac=False, groupsize=-1, clip_ratio=None,
                 fast_scale=False, donate=False):
        self.bits = bits
        self.sym = sym
        self.lac = lac
        self.groupsize = groupsize
        self._clip_ratio = clip_ratio
        self.fast_scale = fast_scale   # per-row reciprocal path (off: exact divide)
        self.donate = donate           # alias input into output (in-place fake quant)
        self.enable = True
        if sym:
            self.q_max = 2 ** (bits - 1) - 1
            self.q_min = -self.q_max - 1
        else:
            self.q_max = 2 ** bits - 1
            self.q_min = 0
        if self.lac:
            init_value = 4.0           # matches torch init: ones * 4.0
            self.clip_factor_a_max = jnp.ones((1,), jnp.float32) * init_value
            self.clip_factor_a_min = jnp.ones((1,), jnp.float32) * init_value

    def _clip(self):
        """Returns (smem_clip_array_or_None, static_clip_consts)."""
        if self.lac:
            cmax = jax.nn.sigmoid(self.clip_factor_a_max)[0]
            cmin = jax.nn.sigmoid(self.clip_factor_a_min)[0]
            return jnp.stack([cmax, cmin]).astype(jnp.float32), (1.0, 1.0)
        if self._clip_ratio is not None:
            cr = float(self._clip_ratio)
            return None, (cr, cr)      # static -> folded into the kernel, no SMEM op
        return None, (1.0, 1.0)        # no clip -> multiplies elided entirely

    def __call__(self, x, scale=None, zero=None):
        if self.bits == 16 or not self.enable:
            return x
        # TODO(synk): externally supplied (scale, zero) in fake_quant is not wired
        # into the kernel; only the self-computed per-token/per-group scale path.
        init_shape = x.shape
        clip_arr, clip_const = self._clip()
        g = self.groupsize
        D = x.shape[-1]

        run = functools.partial(_fake_quant_2d, maxq=self.q_max, sym=self.sym,
                                clip_factors=clip_arr, clip_const=clip_const,
                                fast_scale=self.fast_scale, donate=self.donate)

        if g == -1 or g == D:
            out = run(x.reshape(-1, D))
        elif g % 128 == 0 and x.size % g == 0:
            # >=128-wide groups stay lane-dense after a plain (-1, g) reshape.
            out = run(x.reshape(-1, g))
        elif g > 1 and (g & (g - 1)) == 0 and D % g == 0:
            # Sub-128 groups: keep hidden on the lane axis; per-group reduce
            # happens inside the kernel so stores stay lane-dense.
            out = run(x.reshape(-1, D), group=g)
        else:
            # TODO(synk): non-power-of-two / non-dividing groupsize falls back to a
            # narrow (-1, g) slab, which lowers to masked (lane-sparse) stores.
            out = run(x.reshape(-1, g))
        return out.reshape(init_shape)


# ----------------------------- pure-JAX reference ---------------------------- #
def _reference(x, bits, sym, groupsize=-1, clip=(1.0, 1.0)):
    init_shape = x.shape
    if groupsize != -1:
        r = x.reshape(-1, groupsize)
    else:
        r = x.reshape(-1, x.shape[-1])
    r = r.astype(jnp.float32)
    xmax = jnp.maximum(r.max(1, keepdims=True), 0.0) * clip[0]
    xmin = jnp.minimum(r.min(1, keepdims=True), 0.0) * clip[1]
    if sym:
        maxq = float(2 ** (bits - 1) - 1)
        xmax = jnp.maximum(jnp.abs(xmin), xmax)
        scale = jnp.where(xmax == 0, 1.0, xmax / maxq)
        q = jnp.clip(jnp.round(r / scale), -(maxq + 1), maxq)
        out = scale * q
    else:
        maxq = float(2 ** bits - 1)
        bz = (xmin == 0) & (xmax == 0)
        xmin = jnp.where(bz, -1.0, xmin)
        xmax = jnp.where(bz, 1.0, xmax)
        scale = (xmax - xmin) / maxq
        zero = jnp.round(-xmin / scale)
        q = jnp.clip(jnp.round(r / scale) + zero, 0.0, maxq)
        out = scale * (q - zero)
    return out.reshape(init_shape).astype(x.dtype)


if __name__ == "__main__":
    key = jax.random.PRNGKey(0)
    k1, k2, k3, k4 = jax.random.split(key, 4)

    # 1) asym per-token, no clip (statically specialized: no SMEM operand).
    x = jax.random.normal(k1, (2, 8, 32), dtype=jnp.float32)
    q = ActivationQuantizer(bits=8, sym=False, lac=False, groupsize=-1, clip_ratio=None)
    y = jax.block_until_ready(q(x))
    assert y.shape == x.shape and y.dtype == x.dtype
    assert jnp.allclose(y, _reference(x, 8, False), atol=1e-5, rtol=1e-5)

    # 2) sym per-token with a ragged row count (15 rows): padded-last-block path.
    x2 = jax.random.normal(k2, (3, 5, 32), dtype=jnp.float32)
    q2 = ActivationQuantizer(bits=8, sym=True)
    y2 = jax.block_until_ready(q2(x2))
    assert y2.shape == x2.shape and y2.dtype == x2.dtype
    assert jnp.allclose(y2, _reference(x2, 8, True), atol=1e-5, rtol=1e-5)

    # 3) sub-128 groupsize: lane-dense in-kernel segmented reduce (hidden=128, g=32).
    x3 = jax.random.normal(k3, (2, 8, 128), dtype=jnp.float32)
    q3 = ActivationQuantizer(bits=4, sym=False, groupsize=32)
    y3 = jax.block_until_ready(q3(x3))
    assert y3.shape == x3.shape and y3.dtype == x3.dtype
    assert jnp.allclose(y3, _reference(x3, 4, False, groupsize=32), atol=1e-5, rtol=1e-5)

    # 4) LAC (learned clip) exercises the SMEM clip-factor operand.
    x4 = jax.random.normal(k4, (2, 8, 32), dtype=jnp.float32)
    q4 = ActivationQuantizer(bits=8, sym=True, lac=True)
    y4 = jax.block_until_ready(q4(x4))
    c = float(jax.nn.sigmoid(jnp.float32(4.0)))
    assert jnp.allclose(y4, _reference(x4, 8, True, clip=(c, c)), atol=1e-5, rtol=1e-5)

    print("KERNEL_OK")
</pallas_src>

<mosaic_0001>
module attributes {stable_mosaic.version = 11 : i64} {
  func.func @_fake_quant_kernel(%arg0: i32, %arg1: memref<8x32xf32, #tpu.memory_space<vmem>>, %arg2: memref<8x32xf32, #tpu.memory_space<vmem>>) attributes {dimension_semantics = [#tpu.dimension_semantics<parallel>], iteration_bounds = array<i64: 2>, scalar_prefetch = 0 : i64, scratch_operands = 0 : i64, tpu.core_type = #tpu.core_type<tc>, window_params = [{transform_indices = @transform_0, window_bounds = array<i64: 8, 32>}, {transform_indices = @transform_1, window_bounds = array<i64: 8, 32>}]} {
    %c0 = arith.constant 0 : index
    %c0_0 = arith.constant 0 : index
    %0 = vector.load %arg1[%c0, %c0_0] : memref<8x32xf32, #tpu.memory_space<vmem>>, vector<8x32xf32>
    %cst = arith.constant dense<0xFF800000> : vector<8xf32>
    %1 = vector.multi_reduction <maximumf>, %0, %cst [1] : vector<8x32xf32> to vector<8xf32>
    %2 = vector.shape_cast %1 : vector<8xf32> to vector<8x1xf32>
    %cst_1 = arith.constant dense<0x7F800000> : vector<8xf32>
    %3 = vector.multi_reduction <minimumf>, %0, %cst_1 [1] : vector<8x32xf32> to vector<8xf32>
    %4 = vector.shape_cast %3 : vector<8xf32> to vector<8x1xf32>
    %cst_2 = arith.constant 0.000000e+00 : f32
    %5 = vector.broadcast %cst_2 : f32 to vector<8x1xf32>
    %6 = arith.maximumf %2, %5 : vector<8x1xf32>
    %cst_3 = arith.constant 0.000000e+00 : f32
    %7 = vector.broadcast %cst_3 : f32 to vector<8x1xf32>
    %8 = arith.minimumf %4, %7 : vector<8x1xf32>
    %cst_4 = arith.constant 0.000000e+00 : f32
    %9 = vector.broadcast %cst_4 : f32 to vector<8x1xf32>
    %10 = arith.cmpf oeq, %8, %9 : vector<8x1xf32>
    %cst_5 = arith.constant 0.000000e+00 : f32
    %11 = vector.broadcast %cst_5 : f32 to vector<8x1xf32>
    %12 = arith.cmpf oeq, %6, %11 : vector<8x1xf32>
    %13 = arith.andi %10, %12 : vector<8x1xi1>
    %cst_6 = arith.constant -1.000000e+00 : f32
    %14 = vector.broadcast %cst_6 : f32 to vector<8x1xf32>
    %15 = arith.select %13, %14, %8 : vector<8x1xi1>, vector<8x1xf32>
    %cst_7 = arith.constant 1.000000e+00 : f32
    %16 = vector.broadcast %cst_7 : f32 to vector<8x1xf32>
    %17 = arith.select %13, %16, %6 : vector<8x1xi1>, vector<8x1xf32>
    %18 = arith.subf %17, %15 : vector<8x1xf32>
    %cst_8 = arith.constant 2.550000e+02 : f32
    %19 = vector.broadcast %cst_8 : f32 to vector<8x1xf32>
    %20 = arith.divf %18, %19 : vector<8x1xf32>
    %cst_9 = arith.constant 0.000000e+00 : f32
    %21 = vector.broadcast %cst_9 : f32 to vector<8x1xf32>
    %22 = arith.subf %21, %15 : vector<8x1xf32>
    %23 = arith.divf %22, %20 : vector<8x1xf32>
    %24 = math.roundeven %23 : vector<8x1xf32>
    %25 = vector.broadcast %20 : vector<8x1xf32> to vector<8x32xf32>
    %26 = arith.divf %0, %25 : vector<8x32xf32>
    %27 = math.roundeven %26 : vector<8x32xf32>
    %28 = vector.broadcast %24 : vector<8x1xf32> to vector<8x32xf32>
    %29 = arith.addf %27, %28 : vector<8x32xf32>
    %cst_10 = arith.constant 0.000000e+00 : f32
    %cst_11 = arith.constant 2.550000e+02 : f32
    %30 = vector.broadcast %cst_10 : f32 to vector<8x32xf32>
    %31 = arith.maximumf %30, %29 : vector<8x32xf32>
    %32 = vector.broadcast %cst_11 : f32 to vector<8x32xf32>
    %33 = arith.minimumf %32, %31 : vector<8x32xf32>
    %34 = vector.broadcast %24 : vector<8x1xf32> to vector<8x32xf32>
    %35 = arith.subf %33, %34 : vector<8x32xf32>
    %36 = vector.broadcast %20 : vector<8x1xf32> to vector<8x32xf32>
    %37 = arith.mulf %36, %35 : vector<8x32xf32>
    %c0_12 = arith.constant 0 : index
    %c0_13 = arith.constant 0 : index
    %38 = vector.load %arg2[%c0_12, %c0_13] : memref<8x32xf32, #tpu.memory_space<vmem>>, vector<8x32xf32>
    tpu.vector_store %arg2[%c0_12, %c0_13], %37 {strides = array<i32>} : memref<8x32xf32, #tpu.memory_space<vmem>>, vector<8x32xf32>,
    return
  }
  func.func @transform_0(%arg0: i32) -> (i32, i32) {
    %c0_i32 = arith.constant 0 : i32
    %c0_i32_0 = arith.constant 0 : i32
    return %arg0, %c0_i32 : i32, i32
  }
  func.func @transform_1(%arg0: i32) -> (i32, i32) {
    %c0_i32 = arith.constant 0 : i32
    %c0_i32_0 = arith.constant 0 : i32
    return %arg0, %c0_i32 : i32, i32
  }
}

</mosaic_0001>

<bundles_post_ra>
// kernel: tpu_custom_call.1
= control target key start
LH: loop header
LB: loop body
LE: loop exit
PB: predicated region body
PF: predicated region fallthrough
CT: control target
= control target key end

     0   :  { %6 = vsyncpa [#allocation3], 0  ;;  %s586_s0 = inlined_call_operand.hbm [shape: f32[16,32], index: 0, kind: input, shape index: {}]   ;;  %s587_s1 = inlined_call_operand.hbm [shape: f32[16,32], index: 1, kind: output, shape index: {}]  }
   0x1   :  { %8 = vsyncpa [#allocation3 + $0x1], 0 }
   0x2   :  { %9 = vsyncpa [#allocation4], 0 }
   0x3   :  { %11 = vsyncpa [#allocation4 + $0x1], 0  ;;  %s418_s6 = smov 0   ;;  %s420_s7 = smov 0  }
   0x4   :  { %s422_s8 = smov 0   ;;  %s424_s9 = smov 0  }
   0x5 LB: > { %s439_s10 = sadd.s32 4294967295, %s404_s9   ;;  %s246_s11 = sadd.s32 4294967294, %s404_s9   ;;  %s404_s9 = sphi %s424_s9, %s602_s9   ;;  %s400_s8 = sphi %s422_s8, %s601_s8   ;;  %s396_s7 = sphi %s420_s7, %s600_s7   ;;  %s392_s6 = sphi %s418_s6, %s599_s6  }
   0x6   : > { %s443_s12 = sadd.s32 1, %s404_s9   ;;  %s24_s13 = sadd.s32 1, %s400_s8 }
   0x7   : > { %s21_s14 = ssub.s32 %s404_s9, %s443_s12  ;;  %p31_p0 = scmp.ne.s32.totalorder %s400_s8, %s396_s7 }
   0x8   : > { %p22_p1 = scmp.eq.s32.totalorder %s21_s14, 0  ;;  %p32_p2 = scmp.eq.s32.totalorder %s404_s9, 0 }
   0x9   : > { %p37_p3 = scmp.ne.s32.totalorder %s396_s7, %s392_s6  ;;  %p38_p4 = scmp.eq.s32.totalorder %s439_s10, 0 }
   0xa   : > { %s455_s15 = scalar_select %p22_p1, %s400_s8, %s24_s13  }
   0xb   : > { %p457_p5 = por %p32_p2, %p31_p0  ;;  %p461_p6 = por %p38_p4, %p37_p3 }
   0xc   : > { %p61_p7 = scmp.eq.s32.totalorder %s439_s10, 1  ;;  %p67_p8 = scmp.eq.s32.totalorder %s246_s11, 1 }
   0xd   : > { %p272_p10 = scmp.lt.s32.totalorder %s404_s9, 2  ;;  %s87_s20 = sand.u32 1, %s400_s8  }
   0xe   : > { %p468_p11 = por %p61_p7, %p31_p0  ;;  %p472_p12 = por %p67_p8, %p37_p3 }
   0xf   : > { %s250_s21 = sshll.u32 %s404_s9, 7  ;;  %s249_s22 = sshll.u32 %s87_s20, 3 }
  0x10   : > { %s591_s18 = scalar_select %p468_p11, 1, 0 }
  0x11   : > { %s592_s19 = scalar_select %p472_p12, 1, 0 }
  0x12   : > { %s481_s25 = scalar_lea.hbm %s586_s0, %s250_s21  ;;  %s91_s26 = scalar_lea.vmem [#allocation2], %s249_s22 }
  0x13   : > { %s98_s27 = sshll.u32 %s91_s26, 4  ;;  %p485_p13 = pnand %p272_p10, %p457_p5  ;;  %s489_s27 = int_to_ptr.vmem [resolvable:$true] %s98_s27 }
  0x14   : > { %s88_s29 = scalar_lea.sflag [#allocation3], %s87_s20  ;;  %s308_s30 = scalar_lea.hbm %s481_s25, 128 }
  0x15   : > { %p309_p2 = scmp.ne.s32.totalorder %s481_s25, %s308_s30  ;;  %p310_p3 = pneg %p485_p13 }
  0x16   : > { %s313_s4 = scalar_lea.hbm %s586_s0, 256  ;;  %p314_p5 = scmp.lt.u32.totalorder %s481_s25, %s586_s0 }
  0x17   : > { %p311_p4 = pnand %p310_p3, %p309_p2  ;;  %p315_p8 = scmp.lt.u32.totalorder %s313_s4, %s308_s30 }
  0x18   : > { %p317_p9 = scmp.lt.u32.totalorder %s308_s30, %s481_s25 }
  0x19   : > { %p312_p7 = pneg %p311_p4  ;;  %p316_p10 = por %p315_p8, %p314_p5 }
  0x1b   : > { %p318_p0 = por %p317_p9, %p316_p10 }
  0x1d   : > { %p319_p1 = pnand %p318_p0, %p312_p7 }
  0x1f   : > { %322 = shalt.err (!%p319_p1)
}
  0x20   : > { %s323_s13 = scalar_lea.vmem %s489_s27, 128  ;;  %s406_s14 = smov [#allocation2]  }
  0x21   : > { %p324_p2 = scmp.ne.s32.totalorder %s489_s27, %s323_s13  ;;  %s328_s16 = sshll.u32 %s406_s14, 4  ;;  %s329_s16 = int_to_ptr.vmem [resolvable:$false] %s328_s16 }
  0x22   : > { %s330_s20 = scalar_lea.vmem %s329_s16, 256  ;;  %p331_p11 = scmp.lt.s32.totalorder %s489_s27, %s329_s16 }
  0x23   : > { %p326_p4 = pnand %p324_p2, %p310_p3  ;;  %p332_p5 = scmp.lt.s32.totalorder %s330_s20, %s323_s13 }
  0x25   : > { %p327_p12 = pneg %p326_p4  ;;  %p333_p8 = por %p332_p5, %p331_p11 }
  0x27   : > { %p334_p9 = pnand %p333_p8, %p327_p12 }
  0x29   : > { %337 = shalt.err (!%p334_p9)
}
  0x2a   : > { %267 = dma.hbm_to_vmem [thread:$0]  (!%p485_p13), %s481_s25, 128, %s489_s27, %s88_s29  }
  0x2b   : > { %p594_p0 = scmp.lt.s32.totalorder %s404_s9, 3  ;;  %p595_p1 = scmp.ge.s32.totalorder %s404_s9, 1 }
  0x2d   : > { %p104_p3 = pnand %p595_p1, %p594_p0 }
  0x2e   : > { %s523_s21 = sand.u32 (!%p104_p3), 1, %s396_s7  }
  0x2f   : > { %107 = sbr.rel (%p104_p3) target bundleno = 251 (0xfb), region = 24  ;;  %s252_s22 = sshll.u32 (!%p104_p3), %s523_s21, 3 }
  0x30   : > { %s110_s23 = scalar_lea.sflag (!%p104_p3), [#allocation3], %s523_s21  ;;  %s113_s24 = scalar_lea.vmem (!%p104_p3), [#allocation2], %s252_s22 }
  0x36   : > { %383 = dma.done.wait (%p461_p6), %s110_s23, 128  }
  0x37   : > { %385 = vsyncadd (%p461_p6), %s110_s23, 4294967168  ;;  %vm133_vm0 = vcmask 261120   ;;  %v132_v0 = vld [vmem:[%s113_s24] sm:$0xff]  ;;  %s255_s17 = sshll.u32 %s439_s10, 7  ;;  %s131_s25 = scalar_lea.vmem [#allocation5], %s252_s22 }
  0x38   : > { %v134_v1 = vsel %vm133_vm0, %v132_v0, -inf  ;;  %v137_v2 = vsel %vm133_vm0, %v132_v0, inf  ;;  %s176_s26 = sshll.u32 %s131_s25, 4  ;;  %s541_s29 = scalar_lea.hbm %s587_s1, %s255_s17  ;;  %s543_s26 = int_to_ptr.vmem [resolvable:$true] %s176_s26 }
  0x39   : > { %135 = vmax.xlane.f32.xlu0 %v134_v1  ;;  %s163_s30 = scalar_lea.sflag [#allocation4], %s523_s21  ;;  %s338_s2 = scalar_lea.vmem %s543_s26, 128 }
  0x3a   : > { %p339_p6 = scmp.ne.s32.totalorder %s543_s26, %s338_s2  ;;  %p596_p11 = scmp.ne.s32.totalorder %s591_s18, 0 }
  0x3b   : > { %s407_s10 = smov [#allocation5]  }
  0x3c   : > { %p340_p12 = pnand %p339_p6, %p596_p11  ;;  %s342_s3 = sshll.u32 %s407_s10, 4  ;;  %s343_s3 = int_to_ptr.vmem [resolvable:$false] %s342_s3 }
  0x3d   : > { %138 = vmin.xlane.f32.xlu0 %v137_v2  ;;  %s344_s4 = scalar_lea.vmem %s343_s3, 256  ;;  %p345_p7 = scmp.lt.s32.totalorder %s543_s26, %s343_s3 }
  0x3e   : > { %p341_p13 = pneg %p340_p12  ;;  %p346_p10 = scmp.lt.s32.totalorder %s344_s4, %s338_s2 }
  0x40   : > { %p347_p2 = por %p346_p10, %p345_p7 }
  0x42   : > { %p348_p4 = pnand %p347_p2, %p341_p13 }
  0xc6   : > { %v136_v3 = vpop.xlane.xlu0 %135 }
  0xc7   : > { %v140_v4 = vmax.f32 %v136_v3, 0.0 }
  0xc9   : > { %vm143_vm1 = vcmp.eq.f32.partialorder %v140_v4, 0.0 }
  0xca   : > { %v139_v5 = vpop.xlane.xlu0 %138 }
  0xcb   : > { %v141_v6 = vmin.f32 %v139_v5, 0.0 }
  0xcd   : > { %vm142_vm2 = vcmp.eq.f32.partialorder %v141_v6, 0.0 }
  0xce   : > { %vm144_vm3 = vmand %vm142_vm2, %vm143_vm1 }
  0xcf   : > { %v145_v7 = vsel %vm144_vm3, -1.0, %v141_v6  ;;  %v146_v8 = vsel %vm144_vm3, 1.0, %v140_v4 }
  0xd0   : > { %v147_v9 = vsub.f32 %v146_v8, %v145_v7  ;;  %v150_v11 = vsub.f32 0.0, %v145_v7 }
  0xd2   : > { %v149_v10 = vmul.f32 0.003921569, %v147_v9 }
  0xd4   : > { %306 = vrcp.f32 %v149_v10 }
  0xde   : > { %v307_v12 = vpop.eup %306 }
  0xdf   : > { %v152_v13 = vmul.f32 %v307_v12, %v150_v11  ;;  %v154_v14 = vmul.f32 %v307_v12, %v132_v0 }
  0xe1   : > { %v258_v15 = vround.rtne.f32 %v152_v13  ;;  %v259_v16 = vround.rtne.f32 %v154_v14 }
  0xe3   : > { %v156_v17 = vadd.f32 %v259_v16, %v258_v15 }
  0xe5   : > { %v157_v18 = vmax.f32 %v156_v17, 0.0 }
  0xe7   : > { %v158_v19 = vmin.f32 %v157_v18, 255.0 }
  0xe9   : > { %v159_v20 = vsub.f32 %v158_v19, %v258_v15 }
  0xeb   : > { %v160_v21 = vmul.f32 %v159_v20, %v149_v10 }
  0xed   : > { %161 = vst.msk [vmem:[%s131_s25] sm:$0xff] %vm133_vm0, %v160_v21 }
  0xee   : > { %351 = shalt.err (!%p348_p4)
}
  0xef   : > { %s352_s5 = scalar_lea.hbm %s541_s29, 128  ;;  %s356_s14 = scalar_lea.hbm %s587_s1, 256 }
  0xf0   : > { %p353_p5 = scmp.ne.s32.totalorder %s541_s29, %s352_s5  ;;  %p357_p0 = scmp.lt.u32.totalorder %s541_s29, %s587_s1 }
  0xf1   : > { %p358_p1 = scmp.lt.u32.totalorder %s356_s14, %s352_s5  ;;  %p360_p6 = scmp.lt.u32.totalorder %s352_s5, %s541_s29 }
  0xf2   : > { %p354_p8 = pnand %p353_p5, %p596_p11 }
  0xf3   : > { %p359_p3 = por %p358_p1, %p357_p0 }
  0xf4   : > { %p355_p9 = pneg %p354_p8 }
  0xf5   : > { %p361_p12 = por %p360_p6, %p359_p3 }
  0xf7   : > { %p362_p13 = pnand %p361_p12, %p355_p9 }
  0xf9   : > { %365 = shalt.err (!%p362_p13)
}
  0xfa   : > { %262 = dma.vmem_to_hbm [thread:$0]  (%p596_p11), %s543_s26, 128, %s541_s29, %s163_s30  }
  0xfb PF: > { %s188_s21 = sand.u32 1, %s392_s6   ;;  %p597_p7 = scmp.ne.s32.totalorder %s592_s19, 0 }
  0xfc   : > { %p598_p10 = scmp.ge.s32.totalorder %s404_s9, 2  ;;  %s189_s22 = scalar_lea.sflag [#allocation4], %s188_s21 }
  0xfe   : > { %p269_p2 = pnand %p598_p10, %p597_p7 }
 0x100   : > { %387 = dma.done.wait (!%p269_p2), %s189_s22, 128  }
 0x101   : > { %389 = vsyncadd (!%p269_p2), %s189_s22, 4294967168  ;;  %p14_p4 = scmp.ge.s32.totalorder %s443_s12, 4   ;;  %s599_s6 = smov %s396_s7 }
 0x102   : > { %s600_s7 = smov %s400_s8  ;;  %s601_s8 = smov %s455_s15 }
 0x103   : > { %s602_s9 = smov %s443_s12  ;;  %16 = sbr.rel (!%p14_p4) target bundleno = 5 (0x5), region = 69 }
 0x10a   :  { %194 = vsyncpa [#allocation3], 1 }
 0x10b   :  { %196 = vsyncpa [#allocation3 + $0x1], 1 }
 0x10c   :  { %197 = vsyncpa [#allocation4], 1 }
 0x10d   :  { %199 = vsyncpa [#allocation4 + $0x1], 1 }

</bundles_post_ra>
